<compile_context>
chip_gen: v7x
topology: tpu7x:2x2x1
jax: 0.10.0
libtpu: 0.0.40
codegen_flags: <defaults>
</compile_context>

<pallas_src>
import jax
import jax.numpy as jnp
from jax import lax
from jax.experimental import pallas as pl
from jax.experimental.pallas import tpu as pltpu


def _shift_lanes(a, s):
    """p[:, l] = a[:, l + s]; positions shifted in from outside are zero-filled."""
    C, HW = a.shape
    if s == 0:
        return a
    if s > 0:
        return jnp.concatenate([a[:, s:], jnp.zeros((C, s), a.dtype)], axis=1)
    return jnp.concatenate([jnp.zeros((C, -s), a.dtype), a[:, :HW + s]], axis=1)


def _im2col_3x3(a, W, left_ok, right_ok, extra=None):
    """a: (C, H*W) activation, channels on rows, flattened H*W on lanes.

    Returns the (9*C [+ C_extra], H*W) im2col operand of a 3x3 SAME conv.
    Row index = t*C + c with tap index t = kh*3 + kw.  Vertical out-of-range
    source positions fall off the lane shift (zero-filled); horizontal row-wrap
    is killed with the precomputed column masks `left_ok` / `right_ok`.
    `extra` (if given) is appended as additional K rows -- used to fuse the 1x1
    shortcut into the same MXU matmul as conv2.
    """
    patches = []
    for dh in (-1, 0, 1):
        for dw in (-1, 0, 1):
            p = _shift_lanes(a, dh * W + dw)
            if dw == -1:                          # left neighbor: col 0 is padding
                p = jnp.where(left_ok, p, 0.0)
            elif dw == 1:                         # right neighbor: col W-1 is padding
                p = jnp.where(right_ok, p, 0.0)
            patches.append(p)
    if extra is not None:
        patches.append(extra)
    return jnp.concatenate(patches, axis=0)


def _make_kernel(H, W, learnable_sc):
    HW = H * W

    def _branch(x, w1, b1, w2cat, b2cat, sc_extra):
        # Column masks hoisted: built once per invocation, reused by both im2cols.
        col = lax.broadcasted_iota(jnp.int32, (1, HW), 1) % W
        left_ok = col >= 1
        right_ok = col <= W - 2

        a = jnp.maximum(x, 0.0)                                   # pre-activation ReLU
        im1 = _im2col_3x3(a, W, left_ok, right_ok)                # (9*Cin, HW)
        h1 = jnp.dot(w1, im1, preferred_element_type=jnp.float32) + b1
        h1 = jnp.maximum(h1, 0.0)                                 # (Chid, HW)
        im2 = _im2col_3x3(h1, W, left_ok, right_ok, extra=sc_extra)
        return jnp.dot(w2cat, im2, preferred_element_type=jnp.float32) + b2cat

    if learnable_sc:
        def kernel(x_ref, w1_ref, b1_ref, wcat_ref, bcat_ref, out_ref):
            x = x_ref[0]                                          # (Cin, HW)
            out = _branch(x, w1_ref[...], b1_ref[...],
                          wcat_ref[...], bcat_ref[...], sc_extra=x)
            out_ref[0] = out.astype(out_ref.dtype)                # shortcut already fused
    else:
        def kernel(x_ref, w1_ref, b1_ref, w2_ref, b2_ref, out_ref):
            x = x_ref[0]                                          # (Cin, HW)
            out = _branch(x, w1_ref[...], b1_ref[...],
                          w2_ref[...], b2_ref[...], sc_extra=None)
            out_ref[0] = (out + x).astype(out_ref.dtype)          # identity shortcut
    return kernel


def init_block_params(key, in_channels, out_channels, hidden_channels=None, k_size=3):
    hidden_channels = in_channels if hidden_channels is None else hidden_channels
    ks = jax.random.split(key, 6)
    s = 0.1
    return dict(
        w1=jax.random.normal(ks[0], (k_size, k_size, in_channels, hidden_channels), jnp.float32) * s,
        b1=jax.random.normal(ks[1], (hidden_channels,), jnp.float32) * s,
        w2=jax.random.normal(ks[2], (k_size, k_size, hidden_channels, out_channels), jnp.float32) * s,
        b2=jax.random.normal(ks[3], (out_channels,), jnp.float32) * s,
        wsc=jax.random.normal(ks[4], (1, 1, in_channels, out_channels), jnp.float32) * s,
        bsc=jax.random.normal(ks[5], (out_channels,), jnp.float32) * s,
    )


def block_forward(x_nchw, params, *, downsample=False):
    """Pallas implementation of Block.forward.  x_nchw: (N, Cin, H, W) float32."""
    N, cin, H, W = x_nchw.shape
    w1, b1, w2, b2 = params["w1"], params["b1"], params["w2"], params["b2"]
    chid, cout = w1.shape[3], w2.shape[3]
    learnable_sc = (cin != cout) or downsample
    HW = H * W

    # Free (contiguous) reshape: kernel consumes/produces NCHW with H*W flattened.
    x_flat = x_nchw.reshape(N, cin, HW)

    # Weights transposed so channels sit on rows (M) and the 9 taps fold into K.
    # Row index of the im2col operand is t*Cin + c, so Wt[o, t*Cin + c] = w[kh,kw,c,o].
    w1t = w1.reshape(9, cin, chid).transpose(2, 0, 1).reshape(chid, 9 * cin)
    w2t = w2.reshape(9, chid, cout).transpose(2, 0, 1).reshape(cout, 9 * chid)
    b1c = b1.reshape(chid, 1)
    b2c = b2.reshape(cout, 1)

    if learnable_sc:
        # Fuse the 1x1 shortcut into conv2's matmul: widen K by Cin and fold the
        # two biases together (everything is linear, so this is exact).
        wsct = params["wsc"].reshape(cin, cout).T                 # (Cout, Cin)
        w2cat = jnp.concatenate([w2t, wsct], axis=1)              # (Cout, 9*Chid + Cin)
        b2cat = b2c + params["bsc"].reshape(cout, 1)
        k2 = 9 * chid + cin
    else:
        w2cat, b2cat, k2 = w2t, b2c, 9 * chid

    in_specs = [
        pl.BlockSpec((1, cin, HW), lambda n: (n, 0, 0)),
        pl.BlockSpec((chid, 9 * cin), lambda n: (0, 0)),
        pl.BlockSpec((chid, 1), lambda n: (0, 0)),
        pl.BlockSpec((cout, k2), lambda n: (0, 0)),
        pl.BlockSpec((cout, 1), lambda n: (0, 0)),
    ]
    args = [x_flat, w1t, b1c, w2cat, b2cat]

    flops = N * HW * (2 * 9 * cin * chid + 2 * k2 * cout)
    bytes_accessed = 4 * (x_flat.size + N * cout * HW + sum(int(a.size) for a in args[1:]))

    out_flat = pl.pallas_call(
        _make_kernel(H, W, learnable_sc),
        out_shape=jax.ShapeDtypeStruct((N, cout, HW), jnp.float32),
        grid_spec=pltpu.PrefetchScalarGridSpec(
            num_scalar_prefetch=0,
            grid=(N,),
            in_specs=in_specs,
            out_specs=pl.BlockSpec((1, cout, HW), lambda n: (n, 0, 0)),
        ),
        compiler_params=pltpu.CompilerParams(dimension_semantics=("parallel",)),
        cost_estimate=pl.CostEstimate(flops=flops, transcendentals=0,
                                      bytes_accessed=bytes_accessed),
    )(*args)

    out = out_flat.reshape(N, cout, H, W)
    if downsample:
        # TODO(synk): F.avg_pool2d(2) stays in plain JAX on the fused residual+shortcut
        # sum (pooling is linear, so pool(res)+pool(sc) == pool(res+sc)); doing it
        # in-kernel would shrink the output to 64 lanes and force masked stores.
        out = out.reshape(N, cout, H // 2, 2, W // 2, 2).mean(axis=(3, 5))
    return out


def block_forward_ref(x_nchw, params, *, downsample=False):
    """Pure-JAX reference mirroring the PyTorch module."""
    dn = ("NHWC", "HWIO", "NHWC")
    x = jnp.transpose(x_nchw, (0, 2, 3, 1))
    cin, cout = x.shape[-1], params["w2"].shape[3]

    def pool(t):
        n, h, w, c = t.shape
        return t.reshape(n, h // 2, 2, w // 2, 2, c).mean(axis=(2, 4))

    h = jax.nn.relu(x)
    h = lax.conv_general_dilated(h, params["w1"], (1, 1), "SAME", dimension_numbers=dn) + params["b1"]
    h = jax.nn.relu(h)
    h = lax.conv_general_dilated(h, params["w2"], (1, 1), "SAME", dimension_numbers=dn) + params["b2"]
    if downsample:
        h = pool(h)
    if (cin != cout) or downsample:
        sc = lax.conv_general_dilated(x, params["wsc"], (1, 1), "SAME", dimension_numbers=dn) + params["bsc"]
        if downsample:
            sc = pool(sc)
    else:
        sc = x
    return jnp.transpose(h + sc, (0, 3, 1, 2))


if __name__ == "__main__":
    key = jax.random.PRNGKey(0)
    kx, kp = jax.random.split(key)

    N, Cin, H, W = 2, 4, 16, 16
    Cout = 8                                   # Cin != Cout -> learnable 1x1 shortcut
    x = jax.random.normal(kx, (N, Cin, H, W), jnp.float32)
    params = init_block_params(kp, Cin, Cout)  # hidden_channels defaults to Cin

    # learnable-shortcut path (shortcut fused into conv2's matmul)
    out = jax.block_until_ready(block_forward(x, params, downsample=False))
    ref = block_forward_ref(x, params, downsample=False)
    assert out.shape == (N, Cout, H, W), out.shape
    err = float(jnp.max(jnp.abs(out - ref)))
    assert err < 1e-3, f"learnable-sc max abs error: {err}"

    # identity-shortcut path (cin == cout, no downsample)
    params_id = init_block_params(jax.random.fold_in(kp, 1), Cin, Cin)
    x2 = jax.random.normal(jax.random.fold_in(kx, 1), (N, Cin, H, W), jnp.float32)
    out_id = jax.block_until_ready(block_forward(x2, params_id, downsample=False))
    err_id = float(jnp.max(jnp.abs(out_id - block_forward_ref(x2, params_id, downsample=False))))
    assert err_id < 1e-3, f"identity-sc max abs error: {err_id}"

    # downsample path (pooling applied outside the kernel)
    out_ds = jax.block_until_ready(block_forward(x, params, downsample=True))
    err_ds = float(jnp.max(jnp.abs(out_ds - block_forward_ref(x, params, downsample=True))))
    assert err_ds < 1e-3, f"downsample max abs error: {err_ds}"

    print("KERNEL_OK")
</pallas_src>

<mosaic_0001>
module attributes {stable_mosaic.version = 11 : i64} {
  func.func @kernel(%arg0: i32, %arg1: memref<1x4x256xf32, #tpu.memory_space<vmem>>, %arg2: memref<4x36xf32, #tpu.memory_space<vmem>>, %arg3: memref<4x1xf32, #tpu.memory_space<vmem>>, %arg4: memref<8x40xf32, #tpu.memory_space<vmem>>, %arg5: memref<8x1xf32, #tpu.memory_space<vmem>>, %arg6: memref<1x8x256xf32, #tpu.memory_space<vmem>>) attributes {dimension_semantics = [#tpu.dimension_semantics<parallel>], iteration_bounds = array<i64: 2>, scalar_prefetch = 0 : i64, scratch_operands = 0 : i64, tpu.core_type = #tpu.core_type<tc>, window_params = [{transform_indices = @transform_0, window_bounds = array<i64: 1, 4, 256>}, {pipeline_mode = #tpu.pipeline_mode<synchronous>, transform_indices = @transform_1, window_bounds = array<i64: 4, 36>}, {pipeline_mode = #tpu.pipeline_mode<synchronous>, transform_indices = @transform_2, window_bounds = array<i64: 4, 1>}, {pipeline_mode = #tpu.pipeline_mode<synchronous>, transform_indices = @transform_3, window_bounds = array<i64: 8, 40>}, {pipeline_mode = #tpu.pipeline_mode<synchronous>, transform_indices = @transform_4, window_bounds = array<i64: 8, 1>}, {transform_indices = @transform_5, window_bounds = array<i64: 1, 8, 256>}]} {
    %c0 = arith.constant 0 : index
    %c0_0 = arith.constant 0 : index
    %c0_1 = arith.constant 0 : index
    %0 = vector.load %arg1[%c0, %c0_0, %c0_1] : memref<1x4x256xf32, #tpu.memory_space<vmem>>, vector<1x4x256xf32>
    %1 = vector.shape_cast %0 : vector<1x4x256xf32> to vector<4x256xf32>
    %c0_2 = arith.constant 0 : index
    %c0_3 = arith.constant 0 : index
    %2 = vector.load %arg2[%c0_2, %c0_3] : memref<4x36xf32, #tpu.memory_space<vmem>>, vector<4x36xf32>
    %c0_4 = arith.constant 0 : index
    %c0_5 = arith.constant 0 : index
    %3 = vector.load %arg3[%c0_4, %c0_5] : memref<4x1xf32, #tpu.memory_space<vmem>>, vector<4x1xf32>
    %c0_6 = arith.constant 0 : index
    %c0_7 = arith.constant 0 : index
    %4 = vector.load %arg4[%c0_6, %c0_7] : memref<8x40xf32, #tpu.memory_space<vmem>>, vector<8x40xf32>
    %c0_8 = arith.constant 0 : index
    %c0_9 = arith.constant 0 : index
    %5 = vector.load %arg5[%c0_8, %c0_9] : memref<8x1xf32, #tpu.memory_space<vmem>>, vector<8x1xf32>
    %6 = tpu.iota {dimensions = array<i32: 1>} : vector<1x256xi32>
    %c16_i32 = arith.constant 16 : i32
    %c0_i32 = arith.constant 0 : i32
    %7 = arith.cmpi eq, %c16_i32, %c0_i32 : i32
    %c1_i32 = arith.constant 1 : i32
    %8 = arith.select %7, %c1_i32, %c16_i32 : i32
    %9 = vector.broadcast %8 : i32 to vector<1x256xi32>
    %10 = arith.remsi %6, %9 : vector<1x256xi32>
    %c0_i32_10 = arith.constant 0 : i32
    %11 = vector.broadcast %c0_i32_10 : i32 to vector<1x256xi32>
    %12 = arith.cmpi ne, %10, %11 : vector<1x256xi32>
    %c0_i32_11 = arith.constant 0 : i32
    %13 = vector.broadcast %c0_i32_11 : i32 to vector<1x256xi32>
    %14 = arith.cmpi slt, %10, %13 : vector<1x256xi32>
    %c0_i32_12 = arith.constant 0 : i32
    %15 = arith.cmpi slt, %8, %c0_i32_12 : i32
    %16 = vector.broadcast %15 : i1 to vector<1x256xi1>
    %17 = vector.broadcast %16 : vector<1x256xi1> to vector<1x256xi1>
    %18 = arith.xori %14, %17 : vector<1x256xi1>
    %19 = arith.andi %18, %12 : vector<1x256xi1>
    %20 = vector.broadcast %8 : i32 to vector<1x256xi32>
    %21 = arith.addi %10, %20 : vector<1x256xi32>
    %22 = arith.select %19, %21, %10 : vector<1x256xi1>, vector<1x256xi32>
    %c1_i32_13 = arith.constant 1 : i32
    %23 = vector.broadcast %c1_i32_13 : i32 to vector<1x256xi32>
    %24 = arith.cmpi sge, %22, %23 : vector<1x256xi32>
    %c14_i32 = arith.constant 14 : i32
    %25 = vector.broadcast %c14_i32 : i32 to vector<1x256xi32>
    %26 = arith.cmpi sle, %22, %25 : vector<1x256xi32>
    %cst = arith.constant 0.000000e+00 : f32
    %27 = vector.broadcast %cst : f32 to vector<4x256xf32>
    %28 = arith.maximumf %1, %27 : vector<4x256xf32>
    %cst_14 = arith.constant 0.000000e+00 : f32
    %29 = vector.broadcast %cst_14 : f32 to vector<4x17xf32>
    %30 = vector.extract_strided_slice %28 {offsets = [0, 0], sizes = [4, 239], strides = [1, 1]} : vector<4x256xf32> to vector<4x239xf32>
    %31 = tpu.concatenate %29, %30 in 1 : vector<4x17xf32>, vector<4x239xf32> -> vector<4x256xf32>
    %cst_15 = arith.constant 0.000000e+00 : f32
    %32 = vector.shape_cast %24 : vector<1x256xi1> to vector<1x256xi1>
    %33 = vector.broadcast %32 : vector<1x256xi1> to vector<4x256xi1>
    %34 = vector.broadcast %cst_15 : f32 to vector<4x256xf32>
    %35 = arith.select %33, %31, %34 : vector<4x256xi1>, vector<4x256xf32>
    %cst_16 = arith.constant 0.000000e+00 : f32
    %36 = vector.broadcast %cst_16 : f32 to vector<4x16xf32>
    %37 = vector.extract_strided_slice %28 {offsets = [0, 0], sizes = [4, 240], strides = [1, 1]} : vector<4x256xf32> to vector<4x240xf32>
    %38 = tpu.concatenate %36, %37 in 1 : vector<4x16xf32>, vector<4x240xf32> -> vector<4x256xf32>
    %cst_17 = arith.constant 0.000000e+00 : f32
    %39 = vector.broadcast %cst_17 : f32 to vector<4x15xf32>
    %40 = vector.extract_strided_slice %28 {offsets = [0, 0], sizes = [4, 241], strides = [1, 1]} : vector<4x256xf32> to vector<4x241xf32>
    %41 = tpu.concatenate %39, %40 in 1 : vector<4x15xf32>, vector<4x241xf32> -> vector<4x256xf32>
    %cst_18 = arith.constant 0.000000e+00 : f32
    %42 = vector.shape_cast %26 : vector<1x256xi1> to vector<1x256xi1>
    %43 = vector.broadcast %42 : vector<1x256xi1> to vector<4x256xi1>
    %44 = vector.broadcast %cst_18 : f32 to vector<4x256xf32>
    %45 = arith.select %43, %41, %44 : vector<4x256xi1>, vector<4x256xf32>
    %cst_19 = arith.constant 0.000000e+00 : f32
    %46 = vector.broadcast %cst_19 : f32 to vector<4x1xf32>
    %47 = vector.extract_strided_slice %28 {offsets = [0, 0], sizes = [4, 255], strides = [1, 1]} : vector<4x256xf32> to vector<4x255xf32>
    %48 = tpu.concatenate %46, %47 in 1 : vector<4x1xf32>, vector<4x255xf32> -> vector<4x256xf32>
    %cst_20 = arith.constant 0.000000e+00 : f32
    %49 = vector.shape_cast %24 : vector<1x256xi1> to vector<1x256xi1>
    %50 = vector.broadcast %49 : vector<1x256xi1> to vector<4x256xi1>
    %51 = vector.broadcast %cst_20 : f32 to vector<4x256xf32>
    %52 = arith.select %50, %48, %51 : vector<4x256xi1>, vector<4x256xf32>
    %53 = vector.extract_strided_slice %28 {offsets = [0, 1], sizes = [4, 255], strides = [1, 1]} : vector<4x256xf32> to vector<4x255xf32>
    %cst_21 = arith.constant 0.000000e+00 : f32
    %54 = vector.broadcast %cst_21 : f32 to vector<4x1xf32>
    %55 = tpu.concatenate %53, %54 in 1 : vector<4x255xf32>, vector<4x1xf32> -> vector<4x256xf32>
    %cst_22 = arith.constant 0.000000e+00 : f32
    %56 = vector.shape_cast %26 : vector<1x256xi1> to vector<1x256xi1>
    %57 = vector.broadcast %56 : vector<1x256xi1> to vector<4x256xi1>
    %58 = vector.broadcast %cst_22 : f32 to vector<4x256xf32>
    %59 = arith.select %57, %55, %58 : vector<4x256xi1>, vector<4x256xf32>
    %60 = vector.extract_strided_slice %28 {offsets = [0, 15], sizes = [4, 241], strides = [1, 1]} : vector<4x256xf32> to vector<4x241xf32>
    %cst_23 = arith.constant 0.000000e+00 : f32
    %61 = vector.broadcast %cst_23 : f32 to vector<4x15xf32>
    %62 = tpu.concatenate %60, %61 in 1 : vector<4x241xf32>, vector<4x15xf32> -> vector<4x256xf32>
    %cst_24 = arith.constant 0.000000e+00 : f32
    %63 = vector.shape_cast %24 : vector<1x256xi1> to vector<1x256xi1>
    %64 = vector.broadcast %63 : vector<1x256xi1> to vector<4x256xi1>
    %65 = vector.broadcast %cst_24 : f32 to vector<4x256xf32>
    %66 = arith.select %64, %62, %65 : vector<4x256xi1>, vector<4x256xf32>
    %67 = vector.extract_strided_slice %28 {offsets = [0, 16], sizes = [4, 240], strides = [1, 1]} : vector<4x256xf32> to vector<4x240xf32>
    %cst_25 = arith.constant 0.000000e+00 : f32
    %68 = vector.broadcast %cst_25 : f32 to vector<4x16xf32>
    %69 = tpu.concatenate %67, %68 in 1 : vector<4x240xf32>, vector<4x16xf32> -> vector<4x256xf32>
    %70 = vector.extract_strided_slice %28 {offsets = [0, 17], sizes = [4, 239], strides = [1, 1]} : vector<4x256xf32> to vector<4x239xf32>
    %cst_26 = arith.constant 0.000000e+00 : f32
    %71 = vector.broadcast %cst_26 : f32 to vector<4x17xf32>
    %72 = tpu.concatenate %70, %71 in 1 : vector<4x239xf32>, vector<4x17xf32> -> vector<4x256xf32>
    %cst_27 = arith.constant 0.000000e+00 : f32
    %73 = vector.shape_cast %26 : vector<1x256xi1> to vector<1x256xi1>
    %74 = vector.broadcast %73 : vector<1x256xi1> to vector<4x256xi1>
    %75 = vector.broadcast %cst_27 : f32 to vector<4x256xf32>
    %76 = arith.select %74, %72, %75 : vector<4x256xi1>, vector<4x256xf32>
    %77 = tpu.concatenate %35, %38, %45, %52, %28, %59, %66, %69, %76 in 0 : vector<4x256xf32>, vector<4x256xf32>, vector<4x256xf32>, vector<4x256xf32>, vector<4x256xf32>, vector<4x256xf32>, vector<4x256xf32>, vector<4x256xf32>, vector<4x256xf32> -> vector<36x256xf32>
    %cst_28 = arith.constant dense<0.000000e+00> : vector<4x256xf32>
    %78 = tpu.matmul %2, %77, %cst_28 {dimension_numbers = #tpu.dot_dimension_numbers<[1], [0], [0], [1], [0, 0, 1, 1], [], []>} : vector<4x36xf32>, vector<36x256xf32>, vector<4x256xf32> -> vector<4x256xf32>
    %79 = vector.broadcast %3 : vector<4x1xf32> to vector<4x256xf32>
    %80 = arith.addf %78, %79 : vector<4x256xf32>
    %cst_29 = arith.constant 0.000000e+00 : f32
    %81 = vector.broadcast %cst_29 : f32 to vector<4x256xf32>
    %82 = arith.maximumf %80, %81 : vector<4x256xf32>
    %cst_30 = arith.constant 0.000000e+00 : f32
    %83 = vector.broadcast %cst_30 : f32 to vector<4x17xf32>
    %84 = vector.extract_strided_slice %82 {offsets = [0, 0], sizes = [4, 239], strides = [1, 1]} : vector<4x256xf32> to vector<4x239xf32>
    %85 = tpu.concatenate %83, %84 in 1 : vector<4x17xf32>, vector<4x239xf32> -> vector<4x256xf32>
    %cst_31 = arith.constant 0.000000e+00 : f32
    %86 = vector.shape_cast %24 : vector<1x256xi1> to vector<1x256xi1>
    %87 = vector.broadcast %86 : vector<1x256xi1> to vector<4x256xi1>
    %88 = vector.broadcast %cst_31 : f32 to vector<4x256xf32>
    %89 = arith.select %87, %85, %88 : vector<4x256xi1>, vector<4x256xf32>
    %cst_32 = arith.constant 0.000000e+00 : f32
    %90 = vector.broadcast %cst_32 : f32 to vector<4x16xf32>
    %91 = vector.extract_strided_slice %82 {offsets = [0, 0], sizes = [4, 240], strides = [1, 1]} : vector<4x256xf32> to vector<4x240xf32>
    %92 = tpu.concatenate %90, %91 in 1 : vector<4x16xf32>, vector<4x240xf32> -> vector<4x256xf32>
    %cst_33 = arith.constant 0.000000e+00 : f32
    %93 = vector.broadcast %cst_33 : f32 to vector<4x15xf32>
    %94 = vector.extract_strided_slice %82 {offsets = [0, 0], sizes = [4, 241], strides = [1, 1]} : vector<4x256xf32> to vector<4x241xf32>
    %95 = tpu.concatenate %93, %94 in 1 : vector<4x15xf32>, vector<4x241xf32> -> vector<4x256xf32>
    %cst_34 = arith.constant 0.000000e+00 : f32
    %96 = vector.shape_cast %26 : vector<1x256xi1> to vector<1x256xi1>
    %97 = vector.broadcast %96 : vector<1x256xi1> to vector<4x256xi1>
    %98 = vector.broadcast %cst_34 : f32 to vector<4x256xf32>
    %99 = arith.select %97, %95, %98 : vector<4x256xi1>, vector<4x256xf32>
    %cst_35 = arith.constant 0.000000e+00 : f32
    %100 = vector.broadcast %cst_35 : f32 to vector<4x1xf32>
    %101 = vector.extract_strided_slice %82 {offsets = [0, 0], sizes = [4, 255], strides = [1, 1]} : vector<4x256xf32> to vector<4x255xf32>
    %102 = tpu.concatenate %100, %101 in 1 : vector<4x1xf32>, vector<4x255xf32> -> vector<4x256xf32>
    %cst_36 = arith.constant 0.000000e+00 : f32
    %103 = vector.shape_cast %24 : vector<1x256xi1> to vector<1x256xi1>
    %104 = vector.broadcast %103 : vector<1x256xi1> to vector<4x256xi1>
    %105 = vector.broadcast %cst_36 : f32 to vector<4x256xf32>
    %106 = arith.select %104, %102, %105 : vector<4x256xi1>, vector<4x256xf32>
    %107 = vector.extract_strided_slice %82 {offsets = [0, 1], sizes = [4, 255], strides = [1, 1]} : vector<4x256xf32> to vector<4x255xf32>
    %cst_37 = arith.constant 0.000000e+00 : f32
    %108 = vector.broadcast %cst_37 : f32 to vector<4x1xf32>
    %109 = tpu.concatenate %107, %108 in 1 : vector<4x255xf32>, vector<4x1xf32> -> vector<4x256xf32>
    %cst_38 = arith.constant 0.000000e+00 : f32
    %110 = vector.shape_cast %26 : vector<1x256xi1> to vector<1x256xi1>
    %111 = vector.broadcast %110 : vector<1x256xi1> to vector<4x256xi1>
    %112 = vector.broadcast %cst_38 : f32 to vector<4x256xf32>
    %113 = arith.select %111, %109, %112 : vector<4x256xi1>, vector<4x256xf32>
    %114 = vector.extract_strided_slice %82 {offsets = [0, 15], sizes = [4, 241], strides = [1, 1]} : vector<4x256xf32> to vector<4x241xf32>
    %cst_39 = arith.constant 0.000000e+00 : f32
    %115 = vector.broadcast %cst_39 : f32 to vector<4x15xf32>
    %116 = tpu.concatenate %114, %115 in 1 : vector<4x241xf32>, vector<4x15xf32> -> vector<4x256xf32>
    %cst_40 = arith.constant 0.000000e+00 : f32
    %117 = vector.shape_cast %24 : vector<1x256xi1> to vector<1x256xi1>
    %118 = vector.broadcast %117 : vector<1x256xi1> to vector<4x256xi1>
    %119 = vector.broadcast %cst_40 : f32 to vector<4x256xf32>
    %120 = arith.select %118, %116, %119 : vector<4x256xi1>, vector<4x256xf32>
    %121 = vector.extract_strided_slice %82 {offsets = [0, 16], sizes = [4, 240], strides = [1, 1]} : vector<4x256xf32> to vector<4x240xf32>
    %cst_41 = arith.constant 0.000000e+00 : f32
    %122 = vector.broadcast %cst_41 : f32 to vector<4x16xf32>
    %123 = tpu.concatenate %121, %122 in 1 : vector<4x240xf32>, vector<4x16xf32> -> vector<4x256xf32>
    %124 = vector.extract_strided_slice %82 {offsets = [0, 17], sizes = [4, 239], strides = [1, 1]} : vector<4x256xf32> to vector<4x239xf32>
    %cst_42 = arith.constant 0.000000e+00 : f32
    %125 = vector.broadcast %cst_42 : f32 to vector<4x17xf32>
    %126 = tpu.concatenate %124, %125 in 1 : vector<4x239xf32>, vector<4x17xf32> -> vector<4x256xf32>
    %cst_43 = arith.constant 0.000000e+00 : f32
    %127 = vector.shape_cast %26 : vector<1x256xi1> to vector<1x256xi1>
    %128 = vector.broadcast %127 : vector<1x256xi1> to vector<4x256xi1>
    %129 = vector.broadcast %cst_43 : f32 to vector<4x256xf32>
    %130 = arith.select %128, %126, %129 : vector<4x256xi1>, vector<4x256xf32>
    %131 = tpu.concatenate %89, %92, %99, %106, %82, %113, %120, %123, %130, %1 in 0 : vector<4x256xf32>, vector<4x256xf32>, vector<4x256xf32>, vector<4x256xf32>, vector<4x256xf32>, vector<4x256xf32>, vector<4x256xf32>, vector<4x256xf32>, vector<4x256xf32>, vector<4x256xf32> -> vector<40x256xf32>
    %cst_44 = arith.constant dense<0.000000e+00> : vector<8x256xf32>
    %132 = tpu.matmul %4, %131, %cst_44 {dimension_numbers = #tpu.dot_dimension_numbers<[1], [0], [0], [1], [0, 0, 1, 1], [], []>} : vector<8x40xf32>, vector<40x256xf32>, vector<8x256xf32> -> vector<8x256xf32>
    %133 = vector.broadcast %5 : vector<8x1xf32> to vector<8x256xf32>
    %134 = arith.addf %132, %133 : vector<8x256xf32>
    %c0_45 = arith.constant 0 : index
    %c0_46 = arith.constant 0 : index
    %c0_47 = arith.constant 0 : index
    %135 = vector.load %arg6[%c0_45, %c0_46, %c0_47] : memref<1x8x256xf32, #tpu.memory_space<vmem>>, vector<1x8x256xf32>
    %136 = vector.shape_cast %135 : vector<1x8x256xf32> to vector<8x256xf32>
    %137 = vector.shape_cast %134 : vector<8x256xf32> to vector<1x8x256xf32>
    tpu.vector_store %arg6[%c0_45, %c0_46, %c0_47], %137 {strides = array<i32>} : memref<1x8x256xf32, #tpu.memory_space<vmem>>, vector<1x8x256xf32>,
    return
  }
  func.func @transform_0(%arg0: i32) -> (i32, i32, i32) {
    %c0_i32 = arith.constant 0 : i32
    %c0_i32_0 = arith.constant 0 : i32
    %c0_i32_1 = arith.constant 0 : i32
    return %arg0, %c0_i32, %c0_i32_0 : i32, i32, i32
  }
  func.func @transform_1(%arg0: i32) -> (i32, i32) {
    %c0_i32 = arith.constant 0 : i32
    %c0_i32_0 = arith.constant 0 : i32
    %c0_i32_1 = arith.constant 0 : i32
    return %c0_i32, %c0_i32_0 : i32, i32
  }
  func.func @transform_2(%arg0: i32) -> (i32, i32) {
    %c0_i32 = arith.constant 0 : i32
    %c0_i32_0 = arith.constant 0 : i32
    %c0_i32_1 = arith.constant 0 : i32
    return %c0_i32, %c0_i32_0 : i32, i32
  }
  func.func @transform_3(%arg0: i32) -> (i32, i32) {
    %c0_i32 = arith.constant 0 : i32
    %c0_i32_0 = arith.constant 0 : i32
    %c0_i32_1 = arith.constant 0 : i32
    return %c0_i32, %c0_i32_0 : i32, i32
  }
  func.func @transform_4(%arg0: i32) -> (i32, i32) {
    %c0_i32 = arith.constant 0 : i32
    %c0_i32_0 = arith.constant 0 : i32
    %c0_i32_1 = arith.constant 0 : i32
    return %c0_i32, %c0_i32_0 : i32, i32
  }
  func.func @transform_5(%arg0: i32) -> (i32, i32, i32) {
    %c0_i32 = arith.constant 0 : i32
    %c0_i32_0 = arith.constant 0 : i32
    %c0_i32_1 = arith.constant 0 : i32
    return %arg0, %c0_i32, %c0_i32_0 : i32, i32, i32
  }
}

</mosaic_0001>

<bundles_post_ra>
// kernel: tpu_custom_call.1
= control target key start
LH: loop header
LB: loop body
LE: loop exit
PB: predicated region body
PF: predicated region fallthrough
CT: control target
= control target key end

     0   :  { %10 = vsyncpa [#allocation3], 0  ;;  %s1413_s0 = inlined_call_operand.hbm [shape: f32[2,4,256], index: 0, kind: input, shape index: {}]   ;;  %s1414_s1 = inlined_call_operand.vmem [shape: f32[4,36], index: 1, kind: input, shape index: {}]   ;;  %s1415_s2 = inlined_call_operand.vmem [shape: f32[4,1], index: 2, kind: input, shape index: {}]   ;;  %s1416_s3 = inlined_call_operand.vmem [shape: f32[8,40], index: 3, kind: input, shape index: {}]   ;;  %s1417_s4 = inlined_call_operand.vmem [shape: f32[8,1], index: 4, kind: input, shape index: {}]   ;;  %s1418_s5 = inlined_call_operand.hbm [shape: f32[2,8,256], index: 5, kind: output, shape index: {}]  }
   0x1   :  { %12 = vsyncpa [#allocation3 + $0x1], 0 }
   0x2   :  { %13 = vsyncpa [#allocation4], 0 }
   0x3   :  { %15 = vsyncpa [#allocation4 + $0x1], 0  ;;  %s1073_s18 = smov 0   ;;  %s1075_s19 = smov 0  }
   0x4   :  { %s1077_s20 = smov 0   ;;  %s1079_s21 = smov 0  }
   0x5 LB: > { %s1094_s22 = sadd.s32 4294967295, %s1029_s21   ;;  %s768_s23 = sadd.s32 4294967294, %s1029_s21   ;;  %s1029_s21 = sphi %s1079_s21, %s1441_s21   ;;  %s1025_s20 = sphi %s1077_s20, %s1440_s20   ;;  %s1021_s19 = sphi %s1075_s19, %s1439_s19   ;;  %s1017_s18 = sphi %s1073_s18, %s1438_s18  }
   0x6   : > { %s1098_s24 = sadd.s32 1, %s1029_s21   ;;  %s28_s25 = sadd.s32 1, %s1025_s20 }
   0x7   : > { %s25_s26 = ssub.s32 %s1029_s21, %s1098_s24  ;;  %p35_p0 = scmp.ne.s32.totalorder %s1025_s20, %s1021_s19 }
   0x8   : > { %p26_p1 = scmp.eq.s32.totalorder %s25_s26, 0  ;;  %p36_p2 = scmp.eq.s32.totalorder %s1029_s21, 0 }
   0x9   : > { %p41_p3 = scmp.ne.s32.totalorder %s1021_s19, %s1017_s18  ;;  %p42_p4 = scmp.eq.s32.totalorder %s1094_s22, 0 }
   0xa   : > { %s1110_s27 = scalar_select %p26_p1, %s1025_s20, %s28_s25  }
   0xb   : > { %p1112_p5 = por %p36_p2, %p35_p0  ;;  %p1116_p6 = por %p42_p4, %p41_p3 }
   0xc   : > { %p149_p7 = scmp.eq.s32.totalorder %s1094_s22, 1  ;;  %p155_p8 = scmp.eq.s32.totalorder %s768_s23, 1 }
   0xd   : > { %p816_p10 = scmp.lt.s32.totalorder %s1029_s21, 2  ;;  %s187_s7 = sand.u32 1, %s1025_s20  }
   0xe   : > { %p1123_p11 = por %p149_p7, %p35_p0  ;;  %p1127_p12 = por %p155_p8, %p41_p3 }
   0xf   : > { %s786_s8 = sshll.u32 %s1029_s21, 7  ;;  %s771_s9 = sshll.u32 %s187_s7, 3 }
  0x10   : > { %s1422_s30 = scalar_select %p1123_p11, 1, 0 }
  0x11   : > { %s1423_s6 = scalar_select %p1127_p12, 1, 0 }
  0x12   : > { %s1136_s12 = scalar_lea.hbm %s1413_s0, %s786_s8  ;;  %s191_s13 = scalar_lea.vmem [#allocation2], %s771_s9 }
  0x13   : > { %s199_s14 = sshll.u32 %s191_s13, 4  ;;  %p1140_p13 = pnand %p816_p10, %p1112_p5  ;;  %s1144_s14 = int_to_ptr.vmem [resolvable:$true] %s199_s14 }
  0x14   : > { %s188_s16 = scalar_lea.sflag [#allocation3], %s187_s7  ;;  %s933_s17 = scalar_lea.hbm %s1136_s12, 128 }
  0x15   : > { %p934_p2 = scmp.ne.s32.totalorder %s1136_s12, %s933_s17  ;;  %p935_p3 = pneg %p1140_p13 }
  0x16   : > { %s938_s26 = scalar_lea.hbm %s1413_s0, 256  ;;  %p939_p5 = scmp.lt.u32.totalorder %s1136_s12, %s1413_s0 }
  0x17   : > { %p936_p4 = pnand %p935_p3, %p934_p2  ;;  %p940_p8 = scmp.lt.u32.totalorder %s938_s26, %s933_s17 }
  0x18   : > { %p942_p9 = scmp.lt.u32.totalorder %s933_s17, %s1136_s12 }
  0x19   : > { %p937_p7 = pneg %p936_p4  ;;  %p941_p10 = por %p940_p8, %p939_p5 }
  0x1b   : > { %p943_p0 = por %p942_p9, %p941_p10 }
  0x1d   : > { %p944_p1 = pnand %p943_p0, %p937_p7 }
  0x1f   : > { %947 = shalt.err (!%p944_p1)
}
  0x20   : > { %s948_s7 = scalar_lea.vmem %s1144_s14, 128  ;;  %s1031_s9 = smov [#allocation2]  }
  0x21   : > { %p949_p2 = scmp.ne.s32.totalorder %s1144_s14, %s948_s7  ;;  %s953_s10 = sshll.u32 %s1031_s9, 4  ;;  %s954_s10 = int_to_ptr.vmem [resolvable:$false] %s953_s10 }
  0x22   : > { %s955_s11 = scalar_lea.vmem %s954_s10, 256  ;;  %p956_p11 = scmp.lt.s32.totalorder %s1144_s14, %s954_s10 }
  0x23   : > { %p951_p4 = pnand %p949_p2, %p935_p3  ;;  %p957_p5 = scmp.lt.s32.totalorder %s955_s11, %s948_s7 }
  0x25   : > { %p952_p12 = pneg %p951_p4  ;;  %p958_p8 = por %p957_p5, %p956_p11 }
  0x27   : > { %p959_p9 = pnand %p958_p8, %p952_p12 }
  0x29   : > { %962 = shalt.err (!%p959_p9)
}
  0x2a   : > { %811 = dma.hbm_to_vmem [thread:$0]  (!%p1140_p13), %s1136_s12, 128, %s1144_s14, %s188_s16  }
  0x2b   : > { %p1425_p0 = scmp.lt.s32.totalorder %s1029_s21, 3  ;;  %p1426_p1 = scmp.ge.s32.totalorder %s1029_s21, 1 }
  0x2d   : > { %p205_p3 = pnand %p1426_p1, %p1425_p0 }
  0x2e   : > { %s1178_s13 = sand.u32 (!%p205_p3), 1, %s1021_s19  }
  0x2f   : > { %208 = sbr.rel (%p205_p3) target bundleno = 790 (0x316), region = 40  ;;  %s775_s17 = sshll.u32 (!%p205_p3), %s1178_s13, 3 }
  0x30   : > { %s211_s23 = scalar_lea.sflag (!%p205_p3), [#allocation3], %s1178_s13  ;;  %s214_s25 = scalar_lea.vmem (!%p205_p3), [#allocation2], %s775_s17 }
  0x36   : > { %1008 = dma.done.wait (%p1116_p6), %s211_s23, 128  }
  0x37   : > { %1010 = vsyncadd (%p1116_p6), %s211_s23, 4294967168  ;;  %v1186_v0 = vld [vmem:[%s214_s25] sm:$0xff]  ;;  %s1032_s12 = smov 17   ;;  %s1033_s14 = smov 1   ;;  %v1040_v5 = vmov 0.0   ;;  %v1041_v7 = vmov 0   ;;  %v246_v8 = vlaneseq }
  0x38   : > { %v1189_v1 = vmax.f32 %v1186_v0, 0.0  ;;  %s1034_s29 = smov 15   ;;  %s1035_s15 = smov 16   ;;  %481 = vmatprep.mubr.f32.mxu0 %v1040_v5  ;;  %v243_v6 = vld [vmem:[%s1415_s2] sm:$0xf]  ;;  %674 = vmatprep.mubr.f32.mxu1 %v1040_v5  ;;  %vm284_vm0 = vcmask 138240  }
  0x39   : > { %s1036_s16 = smov 127   ;;  %s1037_s26 = smov 112   ;;  %895 = vset.pattern.permute.xlu1 %v1041_v7  ;;  %931 = vset.pattern.permute.xlu0 %v1041_v7  ;;  %v247_v9 = vand.u32 127, %v246_v8  ;;  %vm322_vm2 = vcmask 7168   ;;  %vm307_vm4 = vcmask 121856   ;;  %vm299_vm5 = vcmask 130048  }
  0x3a   : > { %v1193_v2 = vcombine.high %v1189_v1, %v1189_v1  ;;  %s1038_s28 = smov 113   ;;  %s1039_s8 = smov 111   ;;  %vm333_vm8 = vcmask 1039360   ;;  %vm355_vm9 = vcmask 916480   ;;  %vm393_vm10 = vcmask 1043456   ;;  %v244_v22 = vld [vmem:[%s1416_s3] sm:$0xff] }
  0x3b   : > { %v248_v10 = vadd.s32 128, %v247_v9  ;;  %v253_v11 = vand.u32 15, %v247_v9  ;;  %vm344_vm11 = vcmask 924672   ;;  %vm363_vm12 = vcmask 908288   ;;  %p1435_p11 = scmp.ne.s32.totalorder %s1422_s30, 0  ;;  %s1042_s9 = smov [#allocation5]  }
  0x3c   : > { %v870_v3 = vpack.i.bf16 %v1193_v2, %v1189_v1  ;;  %v880_v4 = vpack.i.bf16 %v1189_v1, %v1193_v2  ;;  %vm407_vm13 = vcmask 293888   ;;  %vm606_vm14 = vcmask 326656   ;;  %s967_s10 = sshll.u32 %s1042_s9, 4  ;;  %s968_s10 = int_to_ptr.vmem [resolvable:$false] %s967_s10 }
  0x3d   : > { %v260_v12 = vand.u32 15, %v248_v10  ;;  %vm1213_vm1 = vcmp.ge.s32.totalorder %v253_v11, 1  ;;  %vm1221_vm6 = vcmp.le.s32.totalorder %v253_v11, 14  ;;  %s969_s11 = scalar_lea.vmem %s968_s10, 512 }
  0x3e   : > { %871 = vrot.lane.b32.xlu1 %v870_v3, %s1032_s12  ;;  %861 = vrot.lane.b32.xlu0 %v870_v3, %s1033_s14 }
  0x3f   : > { %vm1217_vm3 = vcmp.ge.s32.totalorder %v260_v12, 1  ;;  %vm1225_vm7 = vcmp.le.s32.totalorder %v260_v12, 14 }
  0x42   : > { %876 = vrot.lane.b32.xlu1 %v870_v3, %s1034_s29  ;;  %866 = vrot.lane.b32.xlu0 %v870_v3, %s1035_s15 }
  0x46   : > { %881 = vrot.lane.b32.xlu0 %v880_v4, %s1036_s16  ;;  %886 = vrot.lane.b32.xlu1 %v880_v4, %s1037_s26 }
  0x4a   : > { %891 = vrot.lane.b32.xlu0 %v880_v4, %s1038_s28  ;;  %361 = vrot.lane.b32.xlu1 %v1193_v2, %s1039_s8 }
  0x4e   : > { %359 = vrot.lane.b32.xlu0 %v1189_v1, %s1039_s8  ;;  %404 = vperm.xlu1 %895, %v243_v6  }
  0xb0   : > { %v872_v13 = vpop.permute.xlu1 %871  ;;  %v862_v15 = vpop.permute.xlu0 %861 }
  0xb1   : > { %v874_v17 = vunpack.i.h.bf16 %v872_v13  ;;  %v873_v18 = vunpack.i.l.bf16 %v872_v13  ;;  %v864_v19 = vunpack.i.h.bf16 %v862_v15  ;;  %v863_v20 = vunpack.i.l.bf16 %v862_v15 }
  0xb3   : > { %v323_v23 = vsel %vm322_vm2, %v863_v20, %v864_v19  ;;  %v326_v24 = vsel %vm322_vm2, 0.0, %v863_v20  ;;  %v285_v25 = vsel %vm284_vm0, %v873_v18, %v874_v17  ;;  %v288_v33 = vsel %vm284_vm0, 0.0, %v873_v18 }
  0xb4   : > { %v327_v26 = vsel %vm1213_vm1, %v326_v24, 0.0  ;;  %v877_v27 = vpop.permute.xlu1 %876  ;;  %v867_v28 = vpop.permute.xlu0 %866  ;;  %v328_v29 = vsel %vm1217_vm3, %v323_v23, 0.0  ;;  %v294_v35 = vsel %vm1217_vm3, %v285_v25, 0.0  ;;  %v293_v53 = vsel %vm1213_vm1, %v288_v33, 0.0 }
  0xb5   : > { %v879_v30 = vunpack.i.h.bf16 %v877_v27  ;;  %v878_v31 = vunpack.i.l.bf16 %v877_v27  ;;  %v869_v32 = vunpack.i.h.bf16 %v867_v28  ;;  %v868_v34 = vunpack.i.l.bf16 %v867_v28 }
  0xb6   : > { %v377_v36 = vrot.slane %v327_v26, 4  ;;  %v378_v39 = vrot.slane %v328_v29, 4 }
  0xb7   : > { %v311_v37 = vsel %vm307_vm4, 0.0, %v878_v31  ;;  %v308_v38 = vsel %vm307_vm4, %v878_v31, %v879_v30  ;;  %v302_v40 = vsel %vm299_vm5, 0.0, %v868_v34  ;;  %v300_v43 = vsel %vm299_vm5, %v868_v34, %v869_v32 }
  0xb8   : > { %v882_v41 = vpop.permute.xlu0 %881  ;;  %v887_v42 = vpop.permute.xlu1 %886  ;;  %v317_v44 = vsel %vm1225_vm7, %v308_v38, 0.0  ;;  %v316_v45 = vsel %vm1221_vm6, %v311_v37, 0.0  ;;  %v371_v46 = vrot.slane %v302_v40, 4  ;;  %v372_v51 = vrot.slane %v300_v43, 4 }
  0xb9   : > { %v884_v47 = vunpack.i.h.bf16 %v882_v41  ;;  %v883_v48 = vunpack.i.l.bf16 %v882_v41  ;;  %v889_v49 = vunpack.i.h.bf16 %v887_v42  ;;  %v888_v50 = vunpack.i.l.bf16 %v887_v42 }
  0xba   : > { %v397_v52 = vsel %vm393_vm10, %v317_v44, %v378_v39  ;;  %v394_v56 = vsel %vm393_vm10, %v293_v53, %v371_v46  ;;  %v396_v57 = vsel %vm393_vm10, %v316_v45, %v377_v36  ;;  %v395_v8 = vsel %vm393_vm10, %v294_v35, %v372_v51  ;;  %v245_v39 = vld [vmem:[%s1417_s4] sm:$0xff] }
  0xbb   : > { %v334_v54 = vsel %vm333_vm8, %v884_v47, %v883_v48  ;;  %v337_v55 = vsel %vm333_vm8, %v883_v48, 0.0  ;;  %v356_v60 = vsel %vm355_vm9, %v889_v49, %v888_v50  ;;  %v358_v61 = vsel %vm355_vm9, %v888_v50, 0.0 }
  0xbc   : > { %v338_v58 = vsel %vm1221_vm6, %v334_v54, 0.0  ;;  %v339_v59 = vsel %vm1225_vm7, %v337_v55, 0.0  ;;  %v892_v62 = vpop.permute.xlu0 %891  ;;  %v389_v4 = vrot.slane %v356_v60, 4  ;;  %v390_v5 = vrot.slane %v358_v61, 4  ;;  %v362_v10 = vpop.permute.xlu1 %361 }
  0xbd   : > { %v384_v63 = vrot.slane %v338_v58, 4  ;;  %v385_v3 = vrot.slane %v339_v59, 4  ;;  %v894_v6 = vunpack.i.h.bf16 %v892_v62  ;;  %v893_v7 = vunpack.i.l.bf16 %v892_v62 }
  0xbe   : > { %v790_v9 = vpack.c.bf16 %v396_v57, %v394_v56  ;;  %v788_v11 = vpack.c.bf16 %v397_v52, %v395_v8  ;;  %v367_v17 = vsel %vm363_vm12, %v362_v10, 0.0 }
  0xbf   : > { %v345_v12 = vsel %vm344_vm11, %v894_v6, %v893_v7  ;;  %v348_v13 = vsel %vm344_vm11, %v893_v7, 0.0  ;;  %v399_v20 = vsel %vm393_vm10, %v1193_v2, %v385_v3  ;;  %v398_v24 = vsel %vm393_vm10, %v1189_v1, %v384_v63  ;;  %v242_v1 = vld [vmem:[%s1414_s1] sm:$0xf] }
  0xc0   : > { %v350_v15 = vsel %vm1217_vm3, %v348_v13, 0.0  ;;  %789 = vmatprep.subr.bf16.mxu0 %v788_v11  ;;  %v360_v18 = vpop.permute.xlu0 %359  ;;  %v349_v19 = vsel %vm1213_vm1, %v345_v12, 0.0  ;;  %v369_v28 = vsel %vm1225_vm7, %v367_v17, 0.0 }
  0xc1   : > { %791 = vmatpush1.bf16.msra.mxu0 %v790_v9  ;;  %v401_v23 = vsel %vm393_vm10, %v350_v15, %v390_v5  ;;  %v400_v25 = vsel %vm393_vm10, %v349_v19, %v389_v4  ;;  %v364_v29 = vsel %vm363_vm12, %v360_v18, %v362_v10 }
  0xc2   : > { %v792_v26 = vpack.c.bf16 %v401_v23, %v399_v20  ;;  %v794_v27 = vpack.c.bf16 %v400_v25, %v398_v24  ;;  %v368_v30 = vsel %vm1221_vm6, %v364_v29, 0.0 }
  0xc4   : > { %793 = vmatprep.subr.bf16.mxu0 %v792_v26 }
  0xc5   : > { %795 = vmatpush1.bf16.msra.mxu0 %v794_v27 }
  0xc6   : > { %777 = vmatprep.subr.msk.mxu0 %vm393_vm10, %v369_v28 }
  0xc9   : > { %778 = vmatpush1.msk.msra.mxu0 %vm393_vm10, %v368_v30 }
  0xca   : > { %779 = vmatmul.mubr.msk.f32.vlgmr.msra.gmra.mrb[0].mxu0 %vm407_vm13, %v242_v1 }
  0xcd   : > { %v405_v2 = vpop.permute.xlu1 %404 }
 0x19d   : > { %v483_v31 = vpop.f32.mrb[0].mxu0 }
 0x19e   : > { %v484_v32 = vadd.f32 %v483_v31, %v405_v2  ;;  %v485_v33 = vpop.f32.mrb[1].mxu0 }
 0x19f   : > { %v486_v34 = vadd.f32 %v485_v33, %v405_v2 }
 0x1a0   : > { %v1284_v35 = vmax.f32 %v484_v32, 0.0 }
 0x1a1   : > { %v1286_v36 = vmax.f32 %v486_v34, 0.0 }
 0x1a3   : > { %v901_v37 = vpack.i.bf16 %v1286_v36, %v1284_v35  ;;  %v921_v38 = vpack.i.bf16 %v1284_v35, %v1286_v36 }
 0x1a5   : > { %902 = vrot.lane.b32.xlu1 %v901_v37, %s1035_s15  ;;  %897 = vrot.lane.b32.xlu0 %v901_v37, %s1033_s14  ;;  %s776_s14 = sshll.u32 %s1178_s13, 4 }
 0x1a6   : > { %s240_s15 = scalar_lea.vmem [#allocation5], %s776_s14 }
 0x1a9   : > { %912 = vrot.lane.b32.xlu1 %v901_v37, %s1034_s29  ;;  %907 = vrot.lane.b32.xlu0 %v901_v37, %s1032_s12  ;;  %s787_s29 = sshll.u32 %s1094_s22, 8  ;;  %s684_s22 = scalar_lea.sflag [#allocation4], %s1178_s13 }
 0x1ad   : > { %922 = vrot.lane.b32.xlu1 %v921_v38, %s1037_s26  ;;  %917 = vrot.lane.b32.xlu0 %v921_v38, %s1036_s16  ;;  %s698_s16 = sshll.u32 %s240_s15, 4  ;;  %s1371_s16 = int_to_ptr.vmem [resolvable:$true] %s698_s16 }
 0x1ae   : > { %s963_s7 = scalar_lea.vmem %s1371_s16, 256  ;;  %p970_p7 = scmp.lt.s32.totalorder %s1371_s16, %s968_s10 }
 0x1af   : > { %p964_p6 = scmp.ne.s32.totalorder %s1371_s16, %s963_s7  ;;  %p971_p10 = scmp.lt.s32.totalorder %s969_s11, %s963_s7 }
 0x1b1   : > { %558 = vrot.lane.b32.xlu1 %v1286_v36, %s1039_s8  ;;  %927 = vrot.lane.b32.xlu0 %v921_v38, %s1038_s28  ;;  %p965_p12 = pnand %p964_p6, %p1435_p11  ;;  %p972_p2 = por %p971_p10, %p970_p7 }
 0x1b3   : > { %p966_p13 = pneg %p965_p12 }
 0x1b5   : > { %603 = vperm.xlu1 %895, %v245_v39   ;;  %556 = vrot.lane.b32.xlu0 %v1284_v35, %s1039_s8  ;;  %s1369_s8 = scalar_lea.hbm %s1418_s5, %s787_s29  ;;  %p973_p4 = pnand %p972_p2, %p966_p13 }
 0x217   : > { %v903_v40 = vpop.permute.xlu1 %902  ;;  %v898_v41 = vpop.permute.xlu0 %897 }
 0x218   : > { %v900_v42 = vunpack.i.h.bf16 %v898_v41  ;;  %v899_v43 = vunpack.i.l.bf16 %v898_v41  ;;  %v905_v44 = vunpack.i.h.bf16 %v903_v40  ;;  %v904_v45 = vunpack.i.l.bf16 %v903_v40 }
 0x21a   : > { %v523_v46 = vsel %vm322_vm2, %v899_v43, %v900_v42  ;;  %v526_v47 = vsel %vm322_vm2, 0.0, %v899_v43  ;;  %v508_v54 = vsel %vm299_vm5, 0.0, %v904_v45  ;;  %v506_v56 = vsel %vm299_vm5, %v904_v45, %v905_v44 }
 0x21b   : > { %v913_v48 = vpop.permute.xlu1 %912  ;;  %v908_v49 = vpop.permute.xlu0 %907  ;;  %v528_v50 = vsel %vm1217_vm3, %v523_v46, 0.0  ;;  %v527_v57 = vsel %vm1213_vm1, %v526_v47, 0.0  ;;  %v567_v10 = vrot.slane %v508_v54, 4  ;;  %v568_v13 = vrot.slane %v506_v56, 4 }
 0x21c   : > { %v915_v51 = vunpack.i.h.bf16 %v913_v48  ;;  %v914_v52 = vunpack.i.l.bf16 %v913_v48  ;;  %v910_v53 = vunpack.i.h.bf16 %v908_v49  ;;  %v909_v55 = vunpack.i.l.bf16 %v908_v49 }
 0x21d   : > { %v574_v60 = vrot.slane %v528_v50, 4  ;;  %v573_v11 = vrot.slane %v527_v57, 4 }
 0x21e   : > { %v516_v58 = vsel %vm307_vm4, 0.0, %v914_v52  ;;  %v513_v59 = vsel %vm307_vm4, %v914_v52, %v915_v51  ;;  %v499_v61 = vsel %vm284_vm0, 0.0, %v909_v55  ;;  %v496_v3 = vsel %vm284_vm0, %v909_v55, %v910_v53 }
 0x21f   : > { %v923_v62 = vpop.permute.xlu1 %922  ;;  %v918_v63 = vpop.permute.xlu0 %917  ;;  %v518_v4 = vsel %vm1225_vm7, %v513_v59, 0.0  ;;  %v517_v5 = vsel %vm1221_vm6, %v516_v58, 0.0  ;;  %v501_v12 = vsel %vm1217_vm3, %v496_v3, 0.0  ;;  %v500_v19 = vsel %vm1213_vm1, %v499_v61, 0.0 }
 0x220   : > { %v925_v6 = vunpack.i.h.bf16 %v923_v62  ;;  %v924_v7 = vunpack.i.l.bf16 %v923_v62  ;;  %v920_v8 = vunpack.i.h.bf16 %v918_v63  ;;  %v919_v9 = vunpack.i.l.bf16 %v918_v63 }
 0x221   : > { %v594_v18 = vsel %vm393_vm10, %v518_v4, %v574_v60  ;;  %v593_v26 = vsel %vm393_vm10, %v517_v5, %v573_v11  ;;  %v592_v31 = vsel %vm393_vm10, %v501_v12, %v568_v13  ;;  %v591_v32 = vsel %vm393_vm10, %v500_v19, %v567_v10 }
 0x222   : > { %v533_v15 = vsel %vm333_vm8, %v920_v8, %v919_v9  ;;  %v536_v17 = vsel %vm333_vm8, %v919_v9, 0.0  ;;  %v553_v20 = vsel %vm355_vm9, %v925_v6, %v924_v7  ;;  %v555_v27 = vsel %vm355_vm9, %v924_v7, 0.0 }
 0x223   : > { %v537_v23 = vsel %vm1221_vm6, %v533_v15, 0.0  ;;  %v538_v24 = vsel %vm1225_vm7, %v536_v17, 0.0  ;;  %v928_v25 = vpop.permute.xlu0 %927  ;;  %v559_v29 = vpop.permute.xlu1 %558  ;;  %v584_v33 = vrot.slane %v553_v20, 4  ;;  %v796_v34 = vpack.c.bf16 %v594_v18, %v592_v31 }
 0x224   : > { %v579_v28 = vrot.slane %v537_v23, 4  ;;  %v930_v30 = vunpack.i.h.bf16 %v928_v25  ;;  %v580_v1 = vrot.slane %v538_v24, 4  ;;  %v929_v2 = vunpack.i.l.bf16 %v928_v25 }
 0x225   : > { %v798_v37 = vpack.c.bf16 %v593_v26, %v591_v32  ;;  %v585_v38 = vrot.slane %v555_v27, 4  ;;  %v563_v39 = vsel %vm363_vm12, %v559_v29, 0.0  ;;  %797 = vmatprep.subr.bf16.mxu1 %v796_v34 }
 0x226   : > { %v543_v40 = vsel %vm344_vm11, %v930_v30, %v929_v2  ;;  %v546_v41 = vsel %vm344_vm11, %v929_v2, 0.0  ;;  %v596_v45 = vsel %vm393_vm10, %v1286_v36, %v580_v1  ;;  %v595_v47 = vsel %vm393_vm10, %v1284_v35, %v579_v28 }
 0x227   : > { %v557_v42 = vpop.permute.xlu0 %556  ;;  %v548_v43 = vsel %vm1217_vm3, %v546_v41, 0.0  ;;  %v547_v44 = vsel %vm1213_vm1, %v543_v40, 0.0  ;;  %799 = vmatpush1.bf16.msra.mxu1 %v798_v37  ;;  %v565_v16 = vsel %vm1225_vm7, %v563_v39, 0.0  ;;  %v589_v36 = vcombine.low %v1186_v0, %v1186_v0 }
 0x228   : > { %v598_v46 = vsel %vm393_vm10, %v548_v43, %v585_v38  ;;  %v597_v48 = vsel %vm393_vm10, %v547_v44, %v584_v33  ;;  %v560_v49 = vsel %vm363_vm12, %v557_v42, %v559_v29  ;;  %v600_v35 = vsel %vm393_vm10, %v565_v16, %v1186_v0 }
 0x229   : > { %v800_v14 = vpack.c.bf16 %v598_v46, %v596_v45  ;;  %v802_v50 = vpack.c.bf16 %v597_v48, %v595_v47  ;;  %v564_v51 = vsel %vm1221_vm6, %v560_v49, 0.0 }
 0x22a   : > { %v599_v52 = vsel %vm393_vm10, %v564_v51, %v589_v36 }
 0x22b   : > { %801 = vmatprep.subr.bf16.mxu1 %v800_v14 }
 0x22c   : > { %803 = vmatpush1.bf16.msra.mxu1 %v802_v50 }
 0x22d   : > { %618 = vmatprep.subr.mxu1 %v600_v35 }
 0x230   : > { %619 = vmatpush1.msra.mxu1 %v599_v52 }
 0x231   : > { %780 = vmatmul.mubr.msk.f32.vlgmr.msra.gmra.mrb[0].mxu1 %vm606_vm14, %v244_v22 }
 0x234   : > { %v604_v21 = vpop.permute.xlu1 %603 }
 0x304   : > { %v676_v53 = vpop.f32.mrb[0].mxu1 }
 0x305   : > { %v677_v54 = vadd.f32 %v676_v53, %v604_v21  ;;  %v678_v0 = vpop.f32.mrb[1].mxu1 }
 0x306   : > { %v679_v55 = vadd.f32 %v678_v0, %v604_v21 }
 0x307   : > { %681 = vst [vmem:[%s240_s15] sm:$0xff] %v677_v54 }
 0x308   : > { %682 = vst [vmem:[%s240_s15 + $0x8] sm:$0xff] %v679_v55 }
 0x309   : > { %976 = shalt.err (!%p973_p4)
}
 0x30a   : > { %s977_s13 = scalar_lea.hbm %s1369_s8, 256  ;;  %s981_s25 = scalar_lea.hbm %s1418_s5, 512 }
 0x30b   : > { %p978_p5 = scmp.ne.s32.totalorder %s1369_s8, %s977_s13  ;;  %p982_p0 = scmp.lt.u32.totalorder %s1369_s8, %s1418_s5 }
 0x30c   : > { %p983_p1 = scmp.lt.u32.totalorder %s981_s25, %s977_s13  ;;  %p985_p6 = scmp.lt.u32.totalorder %s977_s13, %s1369_s8 }
 0x30d   : > { %p979_p8 = pnand %p978_p5, %p1435_p11 }
 0x30e   : > { %p984_p3 = por %p983_p1, %p982_p0 }
 0x30f   : > { %p980_p9 = pneg %p979_p8 }
 0x310   : > { %p986_p12 = por %p985_p6, %p984_p3 }
 0x312   : > { %p987_p13 = pnand %p986_p12, %p980_p9 }
 0x314   : > { %990 = shalt.err (!%p987_p13)
}
 0x315   : > { %806 = dma.vmem_to_hbm [thread:$0]  (%p1435_p11), %s1371_s16, 256, %s1369_s8, %s684_s22  }
 0x316 PF: > { %s710_s29 = sand.u32 1, %s1017_s18   ;;  %p1436_p7 = scmp.ne.s32.totalorder %s1423_s6, 0 }
 0x317   : > { %p1437_p10 = scmp.ge.s32.totalorder %s1029_s21, 2  ;;  %s711_s15 = scalar_lea.sflag [#allocation4], %s710_s29 }
 0x319   : > { %p813_p2 = pnand %p1437_p10, %p1436_p7 }
 0x31b   : > { %1012 = dma.done.wait (!%p813_p2), %s711_s15, 256  }
 0x31c   : > { %1014 = vsyncadd (!%p813_p2), %s711_s15, 4294967040  ;;  %p18_p4 = scmp.ge.s32.totalorder %s1098_s24, 4   ;;  %s1438_s18 = smov %s1021_s19 }
 0x31d   : > { %s1439_s19 = smov %s1025_s20  ;;  %s1440_s20 = smov %s1110_s27 }
 0x31e   : > { %s1441_s21 = smov %s1098_s24  ;;  %20 = sbr.rel (!%p18_p4) target bundleno = 5 (0x5), region = 85 }
 0x325   :  { %716 = vsyncpa [#allocation3], 1 }
 0x326   :  { %718 = vsyncpa [#allocation3 + $0x1], 1 }
 0x327   :  { %719 = vsyncpa [#allocation4], 1 }
 0x328   :  { %721 = vsyncpa [#allocation4 + $0x1], 1 }

</bundles_post_ra>
